<compile_context>
chip_gen: v7x
topology: tpu7x:2x2x1
jax: 0.10.0
libtpu: 0.0.40
codegen_flags: <defaults>
</compile_context>

<pallas_src>
import jax
import jax.numpy as jnp
from jax.experimental import pallas as pl
from jax.experimental.pallas import tpu as pltpu


_LANE = 128    # lane width (last dim of every tile)
_SUBLANE = 8   # f32 sublane width


def _round_up(n, m):
    return ((n + m - 1) // m) * m


def _fake_quant_ref(w):
    """Pure-JAX reference of per-tensor symmetric int8 fake quantization."""
    max_abs = jnp.max(jnp.abs(w))
    scale = max_abs / 127.0
    safe = jnp.where(scale > 0.0, scale, 1.0)
    wq = jnp.clip(jnp.round(w / safe), -127.0, 127.0) * safe
    return jnp.where(scale > 0.0, wq, w)


def _quantize_int_codes(w):
    """Integer-valued int8 codes (as f32 in [-127,127]) and per-tensor scale.

    Runs wrapper-side as one fused XLA pass.  When max|W| == 0 the codes are
    all zero and scale == 0, matching the reference's where(scale>0, wq, w)
    fallback (both produce a zero output).
    """
    max_abs = jnp.max(jnp.abs(w))
    scale = max_abs / 127.0
    safe = jnp.where(scale > 0.0, scale, 1.0)
    codes = jnp.clip(jnp.round(w / safe), -127.0, 127.0)
    return codes, scale


def simple_model_kernel(scale_ref,               # SMEM (1,) f32: s0 * s1 (folded)
                        x_ref, w0_ref, w1_ref,   # VMEM: bf16 x tile, bf16 int-code weights
                        o_ref):                  # VMEM: f32 output tile
    # layer 0: integer-code matmul + ReLU (scale deferred; valid since s0 >= 0
    # implies relu(s0*a) = s0*relu(a)).  bf16 x bf16 -> f32 accumulate (1 MXU pass).
    h = jnp.dot(x_ref[...], w0_ref[...], preferred_element_type=jnp.float32)
    h = jnp.maximum(h, 0.0).astype(jnp.bfloat16)                 # [tb, H_p]

    # layer 1: integer-code matmul; apply the single folded scale s0*s1 on the
    # small [tb, tn] output tile only.
    out = jnp.dot(h, w1_ref[...], preferred_element_type=jnp.float32)
    o_ref[...] = (out * scale_ref[0]).astype(o_ref.dtype)


def simple_model_forward(x, w0, w1, *, batch_tile=256, out_tile=2048):
    """forward(x) = fq_linear1(relu(fq_linear0(x))) with per-tensor int8 fake quant."""
    B, In = x.shape
    H, In2 = w0.shape
    Out, H2 = w1.shape
    assert In == In2 and H == H2

    # --- wrapper-side quantization (hoisted out of the kernel) ----------------
    w0_codes, s0 = _quantize_int_codes(w0)
    w1_codes, s1 = _quantize_int_codes(w1)
    folded_scale = jnp.reshape(s0 * s1, (1,)).astype(jnp.float32)

    # --- lane-dense padding + pre-transpose -----------------------------------
    In_p = _round_up(In, _LANE)
    H_p = _round_up(H, _LANE)
    tn = min(out_tile, _round_up(Out, _LANE))       # W1 blocked only for very wide layers
    Out_p = _round_up(Out, tn)
    tb = min(_round_up(B, _SUBLANE), batch_tile)    # 256-row tiles fill the 2x256x256 MXU
    B_p = _round_up(B, tb)

    # Integer codes in [-127,127] are exact in bf16; zero padding changes no
    # product.  Weights are pre-transposed so the kernel contracts
    # last-of-LHS with first-of-RHS (no in-kernel transpose).
    x_p = jnp.zeros((B_p, In_p), jnp.bfloat16).at[:B, :In].set(x.astype(jnp.bfloat16))
    w0_p = jnp.zeros((In_p, H_p), jnp.bfloat16).at[:In, :H].set(
        w0_codes.T.astype(jnp.bfloat16))
    w1_p = jnp.zeros((H_p, Out_p), jnp.bfloat16).at[:H, :Out].set(
        w1_codes.T.astype(jnp.bfloat16))

    grid = (B_p // tb, Out_p // tn)

    # --- explicit VMEM budget (double-buffered ins/outs + intermediate) -------
    vmem_bytes = (2 * tb * In_p * 2        # x tile (bf16)
                  + 2 * In_p * H_p * 2     # W0 codes (bf16, grid-invariant)
                  + 2 * H_p * tn * 2       # W1 code slab (bf16)
                  + 2 * tb * tn * 4        # output tile (f32)
                  + tb * H_p * 4)          # layer-0 intermediate
    vmem_limit = int(min(2 * vmem_bytes + (4 << 20), 100 << 20))

    out_p = pl.pallas_call(
        simple_model_kernel,
        out_shape=jax.ShapeDtypeStruct((B_p, Out_p), jnp.float32),
        grid_spec=pltpu.PrefetchScalarGridSpec(
            num_scalar_prefetch=1,
            grid=grid,
            in_specs=[
                pl.BlockSpec((tb, In_p), lambda i, j, s: (i, 0)),    # x batch tile
                pl.BlockSpec((In_p, H_p), lambda i, j, s: (0, 0)),   # W0 codes (resident)
                pl.BlockSpec((H_p, tn), lambda i, j, s: (0, j)),     # W1 code slab
            ],
            out_specs=pl.BlockSpec((tb, tn), lambda i, j, s: (i, j)),
        ),
        compiler_params=pltpu.CompilerParams(
            # No cross-step scratch/state -> both axes can run in any order and
            # be sharded across TensorCores (v7x megacore).
            dimension_semantics=("parallel", "parallel"),
            vmem_limit_bytes=vmem_limit,
        ),
    )(folded_scale, x_p, w0_p, w1_p)

    return out_p[:B, :Out]


if __name__ == "__main__":
    # Small shapes consistent with the module: hidden_size = 32.
    batch, input_size, hidden_size, output_size = 8, 32, 32, 32

    key = jax.random.PRNGKey(0)
    kx, k0, k1 = jax.random.split(key, 3)

    # torch.rand -> uniform [0, 1)
    x = jax.random.uniform(kx, (batch, input_size), dtype=jnp.float32)
    w0 = jax.random.uniform(k0, (hidden_size, input_size), dtype=jnp.float32)
    w1 = jax.random.uniform(k1, (output_size, hidden_size), dtype=jnp.float32)

    out = simple_model_forward(x, w0, w1)
    out = jax.block_until_ready(out)

    # Exact f32 reference of the same math, written as explicit
    # broadcast-multiply-sum so it does not depend on XLA's default TPU matmul
    # path.  Tolerance covers the bf16 activation cast (<0.5% rel), MXU f32
    # accumulation order, and applying the folded scale after the matmuls.
    w0q = _fake_quant_ref(w0)
    w1q = _fake_quant_ref(w1)
    h_ref = jnp.maximum(jnp.sum(x[:, None, :] * w0q[None, :, :], axis=-1), 0.0)
    ref = jnp.sum(h_ref[:, None, :] * w1q[None, :, :], axis=-1)

    assert out.shape == (batch, output_size)
    assert jnp.allclose(out, ref, atol=2e-2, rtol=2e-2), float(
        jnp.max(jnp.abs(out - ref)))

    print("KERNEL_OK")
</pallas_src>

<mosaic_0001>
module attributes {stable_mosaic.version = 11 : i64} {
  func.func @simple_model_kernel(%arg0: i32, %arg1: i32, %arg2: memref<1xf32, #tpu.memory_space<smem>>, %arg3: memref<8x128xbf16, #tpu.memory_space<vmem>>, %arg4: memref<128x128xbf16, #tpu.memory_space<vmem>>, %arg5: memref<128x128xbf16, #tpu.memory_space<vmem>>, %arg6: memref<8x128xf32, #tpu.memory_space<vmem>>) attributes {dimension_semantics = [#tpu.dimension_semantics<parallel>, #tpu.dimension_semantics<parallel>], iteration_bounds = array<i64: 1, 1>, scalar_prefetch = 1 : i64, scratch_operands = 0 : i64, tpu.core_type = #tpu.core_type<tc>, window_params = [{transform_indices = @transform_0, window_bounds = array<i64: 8, 128>}, {pipeline_mode = #tpu.pipeline_mode<synchronous>, transform_indices = @transform_1, window_bounds = array<i64: 128, 128>}, {transform_indices = @transform_2, window_bounds = array<i64: 128, 128>}, {transform_indices = @transform_3, window_bounds = array<i64: 8, 128>}]} {
    %c0 = arith.constant 0 : index
    %c0_0 = arith.constant 0 : index
    %0 = vector.load %arg3[%c0, %c0_0] : memref<8x128xbf16, #tpu.memory_space<vmem>>, vector<8x128xbf16>
    %c0_1 = arith.constant 0 : index
    %c0_2 = arith.constant 0 : index
    %1 = vector.load %arg4[%c0_1, %c0_2] : memref<128x128xbf16, #tpu.memory_space<vmem>>, vector<128x128xbf16>
    %cst = arith.constant dense<0.000000e+00> : vector<8x128xf32>
    %2 = tpu.matmul %0, %1, %cst {dimension_numbers = #tpu.dot_dimension_numbers<[1], [0], [0], [1], [0, 0, 1, 1], [], []>} : vector<8x128xbf16>, vector<128x128xbf16>, vector<8x128xf32> -> vector<8x128xf32>
    %cst_3 = arith.constant 0.000000e+00 : f32
    %3 = vector.broadcast %cst_3 : f32 to vector<8x128xf32>
    %4 = arith.maximumf %2, %3 : vector<8x128xf32>
    %5 = arith.truncf %4 : vector<8x128xf32> to vector<8x128xbf16>
    %c0_4 = arith.constant 0 : index
    %c0_5 = arith.constant 0 : index
    %6 = vector.load %arg5[%c0_4, %c0_5] : memref<128x128xbf16, #tpu.memory_space<vmem>>, vector<128x128xbf16>
    %cst_6 = arith.constant dense<0.000000e+00> : vector<8x128xf32>
    %7 = tpu.matmul %5, %6, %cst_6 {dimension_numbers = #tpu.dot_dimension_numbers<[1], [0], [0], [1], [0, 0, 1, 1], [], []>} : vector<8x128xbf16>, vector<128x128xbf16>, vector<8x128xf32> -> vector<8x128xf32>
    %c0_7 = arith.constant 0 : index
    %8 = memref.load %arg2[%c0_7] : memref<1xf32, #tpu.memory_space<smem>>
    %9 = vector.broadcast %8 : f32 to vector<8x128xf32>
    %10 = arith.mulf %7, %9 : vector<8x128xf32>
    %c0_8 = arith.constant 0 : index
    %c0_9 = arith.constant 0 : index
    %11 = vector.load %arg6[%c0_8, %c0_9] : memref<8x128xf32, #tpu.memory_space<vmem>>, vector<8x128xf32>
    tpu.vector_store %arg6[%c0_8, %c0_9], %10 {strides = array<i32>} : memref<8x128xf32, #tpu.memory_space<vmem>>, vector<8x128xf32>,
    return
  }
  func.func @transform_0(%arg0: i32, %arg1: i32, %arg2: memref<1xf32, #tpu.memory_space<smem>>) -> (i32, i32) {
    %c0_i32 = arith.constant 0 : i32
    %c0_i32_0 = arith.constant 0 : i32
    return %arg0, %c0_i32 : i32, i32
  }
  func.func @transform_1(%arg0: i32, %arg1: i32, %arg2: memref<1xf32, #tpu.memory_space<smem>>) -> (i32, i32) {
    %c0_i32 = arith.constant 0 : i32
    %c0_i32_0 = arith.constant 0 : i32
    %c0_i32_1 = arith.constant 0 : i32
    return %c0_i32, %c0_i32_0 : i32, i32
  }
  func.func @transform_2(%arg0: i32, %arg1: i32, %arg2: memref<1xf32, #tpu.memory_space<smem>>) -> (i32, i32) {
    %c0_i32 = arith.constant 0 : i32
    %c0_i32_0 = arith.constant 0 : i32
    return %c0_i32, %arg1 : i32, i32
  }
  func.func @transform_3(%arg0: i32, %arg1: i32, %arg2: memref<1xf32, #tpu.memory_space<smem>>) -> (i32, i32) {
    %c0_i32 = arith.constant 0 : i32
    return %arg0, %arg1 : i32, i32
  }
}

</mosaic_0001>

<bundles_post_ra>
// kernel: tpu_custom_call.1
= control target key start
LH: loop header
LB: loop body
LE: loop exit
PB: predicated region body
PF: predicated region fallthrough
CT: control target
= control target key end

     0   :  { %10 = vsyncpa [#allocation5], 0  ;;  %s570_s0 = inlined_call_operand.<no memory space> [shape: f32[1], index: 0, kind: input, shape index: {}]   ;;  %s571_s1 = inlined_call_operand.hbm [shape: bf16[8,128], index: 1, kind: input, shape index: {}]   ;;  %s572_s2 = inlined_call_operand.hbm [shape: bf16[128,128], index: 2, kind: input, shape index: {}]   ;;  %s573_s3 = inlined_call_operand.hbm [shape: bf16[128,128], index: 3, kind: input, shape index: {}]   ;;  %s574_s4 = inlined_call_operand.hbm [shape: f32[8,128], index: 4, kind: output, shape index: {}]  }
   0x1   :  { %11 = vsyncpa [#allocation8], 0 }
   0x2   :  { %12 = vsyncpa [#allocation6], 0  ;;  %s480_s15 = smov [#allocation7]   ;;  %s386_s19 = scalar_lea.hbm %s572_s2, 1024 }
   0x3   :  { %s28_s16 = sshll.u32 %s480_s15, 4  ;;  %p387_p0 = scmp.ne.s32.totalorder %s572_s2, %s386_s19  ;;  %s29_s16 = int_to_ptr.vmem [resolvable:$true] %s28_s16 }
   0x4   :  { %p390_p1 = scmp.lt.u32.totalorder %s386_s19, %s572_s2 }
   0x6   :  { %p392_p2 = pnand %p390_p1, %p387_p0 }
   0x8   :  { %395 = shalt.err (!%p392_p2)
}
   0x9   :  { %s396_s24 = scalar_lea.vmem %s29_s16, 1024  ;;  %p401_p4 = scmp.lt.s32.totalorder %s29_s16, %s29_s16 }
   0xa   :  { %p397_p3 = scmp.ne.s32.totalorder %s29_s16, %s396_s24  ;;  %p402_p5 = scmp.lt.s32.totalorder %s396_s24, %s396_s24 }
   0xc   :  { %p403_p6 = por %p402_p5, %p401_p4 }
   0xe   :  { %p404_p7 = pnand %p403_p6, %p397_p3 }
  0x10   :  { %407 = shalt.err (!%p404_p7)
}
  0x11   :  { %s481_s25 = smov 64   ;;  %s482_s26 = smov 4  }
  0x12   :  { %34 = dma.hbm_to_vmem [thread:$0]  %s572_s2, 1024, %s29_s16, [#allocation8], %s481_s25, %s481_s25, %s482_s26  }
  0x13   :  { %s483_s29 = smov [#allocation4]   ;;  %s484_s5 = smov [#allocation9]  }
  0x14   :  { %s19_s30 = sshll.u32 %s483_s29, 4  ;;  %s40_s6 = sshll.u32 %s484_s5, 4  ;;  %s20_s30 = int_to_ptr.vmem [resolvable:$true] %s19_s30  ;;  %s41_s6 = int_to_ptr.vmem [resolvable:$true] %s40_s6 }
  0x15   :  { %s408_s9 = scalar_lea.hbm %s571_s1, 64 }
  0x16   :  { %p409_p8 = scmp.ne.s32.totalorder %s571_s1, %s408_s9  ;;  %p412_p9 = scmp.lt.u32.totalorder %s408_s9, %s571_s1 }
  0x18   :  { %p414_p10 = pnand %p412_p9, %p409_p8 }
  0x1a   :  { %417 = shalt.err (!%p414_p10)
}
  0x1b   :  { %s418_s2 = scalar_lea.vmem %s20_s30, 64  ;;  %p423_p12 = scmp.lt.s32.totalorder %s20_s30, %s20_s30 }
  0x1c   :  { %p419_p11 = scmp.ne.s32.totalorder %s20_s30, %s418_s2  ;;  %p424_p13 = scmp.lt.s32.totalorder %s418_s2, %s418_s2 }
  0x1e   :  { %p425_p0 = por %p424_p13, %p423_p12 }
  0x20   :  { %p426_p1 = pnand %p425_p0, %p419_p11 }
  0x22   :  { %429 = shalt.err (!%p426_p1)
}
  0x23   :  { %22 = dma.hbm_to_vmem [thread:$0]  %s571_s1, 64, %s20_s30, [#allocation5]  }
  0x24   :  { %s430_s18 = scalar_lea.hbm %s573_s3, 1024 }
  0x25   :  { %p431_p2 = scmp.ne.s32.totalorder %s573_s3, %s430_s18  ;;  %p434_p3 = scmp.lt.u32.totalorder %s430_s18, %s573_s3 }
  0x27   :  { %p436_p4 = pnand %p434_p3, %p431_p2 }
  0x29   :  { %439 = shalt.err (!%p436_p4)
}
  0x2a   :  { %s440_s23 = scalar_lea.vmem %s41_s6, 1024  ;;  %p445_p6 = scmp.lt.s32.totalorder %s41_s6, %s41_s6 }
  0x2b   :  { %p441_p5 = scmp.ne.s32.totalorder %s41_s6, %s440_s23  ;;  %p446_p7 = scmp.lt.s32.totalorder %s440_s23, %s440_s23 }
  0x2d   :  { %p447_p8 = por %p446_p7, %p445_p6 }
  0x2f   :  { %p448_p9 = pnand %p447_p8, %p441_p5 }
  0x31   :  { %451 = shalt.err (!%p448_p9)
}
  0x32   :  { %46 = dma.hbm_to_vmem [thread:$0]  %s573_s3, 1024, %s41_s6, [#allocation8], %s481_s25, %s481_s25, %s482_s26  }
  0x33   :  { %474 = dma.done.wait [#allocation5], 64  }
  0x34   :  { %475 = vsyncadd [#allocation5], 4294967232 }
  0x35   :  { %476 = dma.done.wait [#allocation8], 2048  }
  0x36   :  { %477 = vsyncadd [#allocation8], 4294965248  ;;  %v485_v0 = vmov 0.0   ;;  %vm486_vm0 = vmmov 0   ;;  %v370_v1 = vld [vmem:[#allocation7] sm:$0xff]   ;;  %v371_v2 = vld [vmem:[#allocation7 + $0x8] sm:$0xff]   ;;  %v269_v24 = vstv %s570_s0 }
  0x37   :  { %322 = vmatprep.subr.bf16.mxu0 %v485_v0  ;;  %338 = vmatprep.mubr.msk.bf16.mxu0 %vm486_vm0, %v485_v0  ;;  %v372_v3 = vld [vmem:[#allocation7 + $0x10] sm:$0xff]   ;;  %v378_v4 = vld [vmem:[#allocation9] sm:$0xff]   ;;  %v373_v5 = vld [vmem:[#allocation7 + $0x18] sm:$0xff]   ;;  %s487_s26 = smov [#allocation10]  }
  0x38   :  { %342 = vmatprep.subr.bf16.mxu1 %v485_v0  ;;  %358 = vmatprep.mubr.msk.bf16.mxu1 %vm486_vm0, %v485_v0  ;;  %v379_v6 = vld [vmem:[#allocation9 + $0x8] sm:$0xff]   ;;  %v374_v7 = vld [vmem:[#allocation7 + $0x20] sm:$0xff]   ;;  %v380_v8 = vld [vmem:[#allocation9 + $0x10] sm:$0xff]   ;;  %s278_s27 = sshll.u32 %s487_s26, 4  ;;  %s279_s27 = int_to_ptr.vmem [resolvable:$true] %s278_s27 }
  0x39   :  { %323 = vmatpush3.bf16.msra.mxu0 %v370_v1  ;;  %343 = vmatpush3.bf16.msra.mxu1 %v378_v4  ;;  %v375_v9 = vld [vmem:[#allocation7 + $0x28] sm:$0xff]   ;;  %v381_v10 = vld [vmem:[#allocation9 + $0x18] sm:$0xff]   ;;  %v376_v11 = vld [vmem:[#allocation7 + $0x30] sm:$0xff]   ;;  %s452_s28 = scalar_lea.vmem %s279_s27, 128  ;;  %p457_p11 = scmp.lt.s32.totalorder %s279_s27, %s279_s27 }
  0x3a   :  { %324 = vmatprep.subr.bf16.mxu0 %v485_v0  ;;  %344 = vmatprep.subr.bf16.mxu1 %v485_v0  ;;  %v382_v12 = vld [vmem:[#allocation9 + $0x20] sm:$0xff]   ;;  %v377_v13 = vld [vmem:[#allocation7 + $0x38] sm:$0xff]   ;;  %v383_v14 = vld [vmem:[#allocation9 + $0x28] sm:$0xff]   ;;  %p453_p10 = scmp.ne.s32.totalorder %s279_s27, %s452_s28  ;;  %p458_p12 = scmp.lt.s32.totalorder %s452_s28, %s452_s28 }
  0x3b   :  { %v57_v15 = vld [vmem:[#allocation4] sm:$0xf]  ;;  %v384_v16 = vld [vmem:[#allocation9 + $0x30] sm:$0xff]  }
  0x3c   :  { %v385_v17 = vld [vmem:[#allocation9 + $0x38] sm:$0xff]   ;;  %p459_p13 = por %p458_p12, %p457_p11 }
  0x3d   :  { %325 = vmatpush3.bf16.msra.mxu0 %v371_v2  ;;  %345 = vmatpush3.bf16.msra.mxu1 %v379_v6 }
  0x3e   :  { %326 = vmatprep.subr.bf16.mxu0 %v485_v0  ;;  %346 = vmatprep.subr.bf16.mxu1 %v485_v0  ;;  %p460_p0 = pnand %p459_p13, %p453_p10 }
  0x41   :  { %327 = vmatpush3.bf16.msra.mxu0 %v372_v3  ;;  %347 = vmatpush3.bf16.msra.mxu1 %v380_v8 }
  0x42   :  { %328 = vmatprep.subr.bf16.mxu0 %v485_v0  ;;  %348 = vmatprep.subr.bf16.mxu1 %v485_v0 }
  0x45   :  { %329 = vmatpush3.bf16.msra.mxu0 %v373_v5  ;;  %349 = vmatpush3.bf16.msra.mxu1 %v381_v10 }
  0x46   :  { %330 = vmatprep.subr.bf16.mxu0 %v485_v0  ;;  %350 = vmatprep.subr.bf16.mxu1 %v485_v0 }
  0x49   :  { %331 = vmatpush3.bf16.msra.mxu0 %v374_v7  ;;  %351 = vmatpush3.bf16.msra.mxu1 %v382_v12 }
  0x4a   :  { %332 = vmatprep.subr.bf16.mxu0 %v485_v0  ;;  %352 = vmatprep.subr.bf16.mxu1 %v485_v0 }
  0x4d   :  { %333 = vmatpush3.bf16.msra.mxu0 %v375_v9  ;;  %353 = vmatpush3.bf16.msra.mxu1 %v383_v14 }
  0x4e   :  { %334 = vmatprep.subr.bf16.mxu0 %v485_v0  ;;  %354 = vmatprep.subr.bf16.mxu1 %v485_v0 }
  0x51   :  { %335 = vmatpush3.bf16.msra.mxu0 %v376_v11  ;;  %355 = vmatpush3.bf16.msra.mxu1 %v384_v16 }
  0x52   :  { %336 = vmatprep.subr.bf16.mxu0 %v485_v0  ;;  %356 = vmatprep.subr.bf16.mxu1 %v485_v0 }
  0x55   :  { %337 = vmatpush3.bf16.msra.mxu0 %v377_v13  ;;  %357 = vmatpush3.bf16.msra.mxu1 %v385_v17 }
  0x58   :  { %339 = vmatmul.mubr.bf16.vlgmr.msra.gmra.mrb[0].mxu0 %v57_v15 }
 0x12b   :  { %v156_v18 = vpop.f32.mrb[0].mxu0 }
 0x12c   :  { %v162_v19 = vmax.f32 %v156_v18, 0.0  ;;  %v340_v20 = vpop.f32.mrb[1].mxu0 }
 0x12d   :  { %v159_v21 = vpop.f32.mrb[2].mxu0 }
 0x12e   :  { %v163_v22 = vpack.c.bf16 %v162_v19, %v162_v19  ;;  %v341_v23 = vpop.f32.mrb[3].mxu0 }
 0x130   :  { %359 = vmatmul.mubr.bf16.vlgmr.msra.gmra.mrb[0].mxu1 %v163_v22 }
 0x203   :  { %v262_v25 = vpop.f32.mrb[0].mxu1 }
 0x204   :  { %v270_v26 = vmul.f32 %v269_v24, %v262_v25  ;;  %v360_v27 = vpop.f32.mrb[1].mxu1 }
 0x205   :  { %v265_v28 = vpop.f32.mrb[2].mxu1 }
 0x206   :  { %271 = vst [vmem:[#allocation10] sm:$0xff] %v270_v26  ;;  %v361_v29 = vpop.f32.mrb[3].mxu1 }
 0x207   :  { %463 = shalt.err (!%p460_p0)
}
 0x208   :  { %s464_s0 = scalar_lea.hbm %s574_s4, 128 }
 0x209   :  { %p465_p1 = scmp.ne.s32.totalorder %s574_s4, %s464_s0  ;;  %p468_p2 = scmp.lt.u32.totalorder %s464_s0, %s574_s4 }
 0x20b   :  { %p470_p3 = pnand %p468_p2, %p465_p1 }
 0x20d   :  { %473 = shalt.err (!%p470_p3)
}
 0x20e   :  { %281 = dma.vmem_to_hbm [thread:$0]  %s279_s27, 128, %s574_s4, [#allocation6]  }
 0x20f   :  { %478 = dma.done.wait [#allocation6], 128  }
 0x210   :  { %479 = vsyncadd [#allocation6], 4294967168 }
 0x211   :  { %285 = vsyncpa [#allocation5], 1 }
 0x212   :  { %286 = vsyncpa [#allocation8], 1 }
 0x213   :  { %287 = vsyncpa [#allocation6], 1 }

</bundles_post_ra>
